<compile_context>
chip_gen: v7x
topology: tpu7x:2x2x1
jax: 0.10.0
libtpu: 0.0.40
codegen_flags: <defaults>
</compile_context>

<pallas_src>
import math

import jax
import jax.numpy as jnp
from jax.experimental import pallas as pl
from jax.experimental.pallas import tpu as pltpu


# ---------------------------------------------------------------------------
# Kernel: out[:, j] = z0[:, j] + sum_k  zcat[:, k] @ OpCat[k, j]
# ---------------------------------------------------------------------------
def _mesh_conv_transpose_kernel(z0_ref, zcat_ref, opcat_ref, out_ref, acc_ref):
    # z0_ref    : (M, tile_nv)       f32   identity term + bias (M = B*C_out)
    # zcat_ref  : (M, tile_k)        bf16  coeff-mixed activations, K-stacked
    # opcat_ref : (tile_k, tile_nv)  bf16  [L^T ; GeV^T ; GnV^T] K-stacked tile
    # out_ref   : (M, tile_nv)       f32
    # acc_ref   : (M, tile_nv)       f32 scratch accumulator
    k = pl.program_id(1)

    @pl.when(k == 0)
    def _init():
        acc_ref[...] = z0_ref[...]          # identity feature + bias, kept in f32

    acc_ref[...] += jnp.dot(zcat_ref[...], opcat_ref[...],
                            preferred_element_type=jnp.float32)

    @pl.when(k == pl.num_programs(1) - 1)
    def _finalize():
        out_ref[...] = acc_ref[...]


# ---------------------------------------------------------------------------
# One-time setup (analogue of the module's registered buffers)
# ---------------------------------------------------------------------------
def prepare_mesh_conv_transpose(G, L, F2V, NS, EW, nv, nv_prev,
                                compute_dtype=jnp.bfloat16, lane=128):
    """Fold EW/NS/F2V into the gradient operator, stack L^T/GeV^T/GnV^T along
    the contraction dimension, pad to a lane multiple, cast to matmul dtype."""
    nf = F2V.shape[1]
    nv_pad = ((nv + lane - 1) // lane) * lane

    G3 = G.reshape(3, nf, nv)                    # G3[k, f, v] = G[k*nf + f, v]
    Ge = jnp.einsum('fk,kfv->fv', EW, G3)        # (nf, nv)
    Gn = jnp.einsum('fk,kfv->fv', NS, G3)
    GeV = F2V @ Ge                               # (nv, nv)
    GnV = F2V @ Gn

    def _pad_t(op):                              # (nv, nv) -> op^T zero-padded
        return jnp.pad(op.T, ((0, nv_pad - nv), (0, nv_pad - nv)))

    # Single stacked right-operator (3*nv_pad, nv_pad): one DMA stream, one dot.
    op_cat = jnp.concatenate([_pad_t(L), _pad_t(GeV), _pad_t(GnV)],
                             axis=0).astype(compute_dtype)
    # TODO(synk): with the real (sparse) mesh operators, build a block-sparse
    # layout here (nonzero K-blocks per output tile fed via scalar prefetch)
    # and/or quantize to fp8 (v7x) / int8 (v5e/v6e) with per-tile scales; the
    # synthetic operators here are dense so neither helps in this script.
    return dict(OpCat=op_cat, nv=nv, nv_prev=nv_prev, nv_pad=nv_pad,
                compute_dtype=compute_dtype)


# ---------------------------------------------------------------------------
# Tiling / per-generation defaults
# ---------------------------------------------------------------------------
def _largest_dividing_tile(n_pad, target):
    """Largest multiple of 128 that divides n_pad and is <= target."""
    lanes = n_pad // 128
    t = max(1, min(target // 128, lanes))
    while lanes % t:
        t -= 1
    return t * 128


def _chip_defaults():
    """(tile_target, vmem_limit_bytes) per TPU generation."""
    tile_target, vmem_limit = 512, 48 << 20          # safe on v7x (64 MiB VMEM)
    try:
        cap = getattr(pltpu.get_tpu_info(), 'vmem_capacity_bytes', 64 << 20)
        if cap >= (96 << 20):                         # v5e / v6e: 128 MiB VMEM
            tile_target, vmem_limit = 1024, 96 << 20
    except Exception:
        pass
    return tile_target, vmem_limit


# ---------------------------------------------------------------------------
# Forward wrapper
# ---------------------------------------------------------------------------
def mesh_conv_transpose(x, ops, coeffs, bias, *, tile_nv=None, tile_k=None):
    """x: (B, C_in, nv_prev) -> (B, C_out, nv).  `ops` from prepare_*()."""
    nv, nv_prev, nv_pad = ops['nv'], ops['nv_prev'], ops['nv_pad']
    cdt = ops['compute_dtype']
    B, c_in, nvp_in = x.shape
    assert nvp_in == nv_prev
    c_out = coeffs.shape[0]
    m = B * c_out

    tile_target, vmem_limit = _chip_defaults()
    if tile_nv is None:
        tile_nv = _largest_dividing_tile(nv_pad, tile_target)
    if tile_k is None:
        tile_k = _largest_dividing_tile(nv_pad, tile_target)
    assert nv_pad % tile_nv == 0 and nv_pad % tile_k == 0   # tile_k | 3*nv_pad

    # torch.cat((input, ones), -1), then zero-pad up to a lane multiple.
    x_pad = jnp.concatenate(
        [x.astype(jnp.float32),
         jnp.ones((B, c_in, nv - nv_prev), jnp.float32),
         jnp.zeros((B, c_in, nv_pad - nv), jnp.float32)], axis=-1)  # (B,C_in,nv_pad)

    # Pre-fold coefficient mixing: z_k[b,o,v] = sum_c coeffs[o,c,k]*x_pad[b,c,v].
    z = jnp.einsum('ock,bcv->kbov', coeffs.astype(jnp.float32), x_pad)
    z = z.reshape(4, m, nv_pad)                                     # (4, M, nv_pad)
    z0 = z[0] + jnp.tile(bias.astype(jnp.float32), B)[:, None]      # identity + bias (f32)
    zcat = jnp.concatenate([z[1], z[2], z[3]], axis=1).astype(cdt)  # (M, 3*nv_pad)

    grid = (nv_pad // tile_nv, (3 * nv_pad) // tile_k)              # K axis last

    out = pl.pallas_call(
        _mesh_conv_transpose_kernel,
        out_shape=jax.ShapeDtypeStruct((m, nv_pad), jnp.float32),
        grid_spec=pltpu.PrefetchScalarGridSpec(
            num_scalar_prefetch=0,
            grid=grid,
            in_specs=[
                pl.BlockSpec((m, tile_nv), lambda j, k: (0, j)),       # z0
                pl.BlockSpec((m, tile_k), lambda j, k: (0, k)),        # zcat
                pl.BlockSpec((tile_k, tile_nv), lambda j, k: (k, j)),  # stacked op
            ],
            out_specs=pl.BlockSpec((m, tile_nv), lambda j, k: (0, j)),
            scratch_shapes=[pltpu.VMEM((m, tile_nv), jnp.float32)],
        ),
        compiler_params=pltpu.CompilerParams(
            dimension_semantics=("parallel", "arbitrary"),
            vmem_limit_bytes=vmem_limit),
    )(z0, zcat, ops['OpCat'])

    return out.reshape(B, c_out, nv_pad)[:, :, :nv]


# ---------------------------------------------------------------------------
# Pure-JAX transcription of the PyTorch forward (for verification)
# ---------------------------------------------------------------------------
def _reference_forward(x, G, L, F2V, NS, EW, coeffs, bias, nv):
    b, c, nv_prev = x.shape
    nf = F2V.shape[1]
    x_pad = jnp.concatenate(
        [x, jnp.ones((b, c, nv - nv_prev), x.dtype)], axis=-1)
    gf = jnp.einsum('bcv,gv->bcg', x_pad, G)                 # spmatmul(x, G)
    gf = gf.reshape(b, c, 3, nf).transpose(0, 1, 3, 2)       # (B, C, nf, 3)
    lap = jnp.einsum('bcv,uv->bcu', x_pad, L)                # spmatmul(x, L)
    gfe = jnp.sum(gf * EW, axis=-1)                          # (B, C, nf)
    gfn = jnp.sum(gf * NS, axis=-1)
    gve = jnp.einsum('bcf,uf->bcu', gfe, F2V)
    gvn = jnp.einsum('bcf,uf->bcu', gfn, F2V)
    feat = jnp.stack([x_pad, lap, gve, gvn], axis=-1)        # (B, C, nv, 4)
    out = jnp.einsum('bcvk,ock->bov', feat, coeffs)
    return out + bias[None, :, None]


if __name__ == "__main__":
    # icosphere-level-2-ish synthetic sizes: nv = 162, nv_prev = 42, nf = 320
    B, C_IN, C_OUT = 2, 4, 8
    NV, NV_PREV, NF = 162, 42, 320
    NCOEFF = 4

    key = jax.random.PRNGKey(0)
    kx, kg, kl, kf, kns, kew, kc, kb = jax.random.split(key, 8)

    x = jax.random.normal(kx, (B, C_IN, NV_PREV), dtype=jnp.float32)

    # synthetic mesh operators (dense stand-ins for the sparse buffers)
    # TODO(synk): real G/L/F2V/NS/EW come from the mesh pickle; synthesized here.
    G = jax.random.normal(kg, (3 * NF, NV), dtype=jnp.float32) * 0.1
    L = jax.random.normal(kl, (NV, NV), dtype=jnp.float32) * 0.1
    F2V = jax.random.uniform(kf, (NV, NF), dtype=jnp.float32) * 0.1
    NS = jax.random.normal(kns, (NF, 3), dtype=jnp.float32)
    EW = jax.random.normal(kew, (NF, 3), dtype=jnp.float32)

    # parameters matching set_coeffs(): uniform(-stdv, stdv), stdv = 1/sqrt(C_in*4)
    stdv = 1.0 / math.sqrt(C_IN * NCOEFF)
    coeffs = jax.random.uniform(kc, (C_OUT, C_IN, NCOEFF), dtype=jnp.float32,
                                minval=-stdv, maxval=stdv)
    bias = jax.random.uniform(kb, (C_OUT,), dtype=jnp.float32,
                              minval=-stdv, maxval=stdv)

    ref = _reference_forward(x, G, L, F2V, NS, EW, coeffs, bias, NV)

    # f32 operator path (tight tolerance).
    ops32 = prepare_mesh_conv_transpose(G, L, F2V, NS, EW, NV, NV_PREV,
                                        compute_dtype=jnp.float32)
    out32 = jax.block_until_ready(mesh_conv_transpose(x, ops32, coeffs, bias))
    assert out32.shape == (B, C_OUT, NV)
    assert jnp.allclose(out32, ref, atol=1e-3, rtol=1e-3), "f32 mismatch vs reference"

    # bf16 matmul-input path (recommended on v5e/v6e/v7x), f32 accumulation,
    # identity term and accumulator kept in f32.
    opsbf = prepare_mesh_conv_transpose(G, L, F2V, NS, EW, NV, NV_PREV,
                                        compute_dtype=jnp.bfloat16)
    outbf = jax.block_until_ready(mesh_conv_transpose(x, opsbf, coeffs, bias))
    assert outbf.shape == (B, C_OUT, NV)
    assert jnp.allclose(outbf, ref, atol=5e-2, rtol=5e-2), "bf16 mismatch vs reference"

    print("KERNEL_OK")
</pallas_src>

<mosaic_0001>
module attributes {stable_mosaic.version = 11 : i64} {
  func.func @_mesh_conv_transpose_kernel(%arg0: i32, %arg1: i32, %arg2: memref<16x256xf32, #tpu.memory_space<vmem>>, %arg3: memref<16x256xf32, #tpu.memory_space<vmem>>, %arg4: memref<256x256xf32, #tpu.memory_space<vmem>>, %arg5: memref<16x256xf32, #tpu.memory_space<vmem>>, %arg6: memref<16x256xf32, #tpu.memory_space<vmem>>) attributes {dimension_semantics = [#tpu.dimension_semantics<parallel>, #tpu.dimension_semantics<arbitrary>], iteration_bounds = array<i64: 1, 3>, scalar_prefetch = 0 : i64, scratch_operands = 1 : i64, tpu.core_type = #tpu.core_type<tc>, window_params = [{transform_indices = @transform_0, window_bounds = array<i64: 16, 256>}, {transform_indices = @transform_1, window_bounds = array<i64: 16, 256>}, {transform_indices = @transform_2, window_bounds = array<i64: 256, 256>}, {transform_indices = @transform_3, window_bounds = array<i64: 16, 256>}]} {
    %c0_i32 = arith.constant 0 : i32
    %0 = arith.cmpi eq, %arg1, %c0_i32 : i32
    %1 = arith.extui %0 : i1 to i32
    %c0_i32_0 = arith.constant 0 : i32
    %2 = arith.cmpi ne, %1, %c0_i32_0 : i32
    scf.if %2 {
      %c0_9 = arith.constant 0 : index
      %c0_10 = arith.constant 0 : index
      %12 = vector.load %arg2[%c0_9, %c0_10] : memref<16x256xf32, #tpu.memory_space<vmem>>, vector<16x256xf32>
      %c0_11 = arith.constant 0 : index
      %c0_12 = arith.constant 0 : index
      %13 = vector.load %arg6[%c0_11, %c0_12] : memref<16x256xf32, #tpu.memory_space<vmem>>, vector<16x256xf32>
      tpu.vector_store %arg6[%c0_11, %c0_12], %12 {strides = array<i32>} : memref<16x256xf32, #tpu.memory_space<vmem>>, vector<16x256xf32>,
    } else {
    }
    %c0 = arith.constant 0 : index
    %c0_1 = arith.constant 0 : index
    %3 = vector.load %arg6[%c0, %c0_1] : memref<16x256xf32, #tpu.memory_space<vmem>>, vector<16x256xf32>
    %c0_2 = arith.constant 0 : index
    %c0_3 = arith.constant 0 : index
    %4 = vector.load %arg3[%c0_2, %c0_3] : memref<16x256xf32, #tpu.memory_space<vmem>>, vector<16x256xf32>
    %c0_4 = arith.constant 0 : index
    %c0_5 = arith.constant 0 : index
    %5 = vector.load %arg4[%c0_4, %c0_5] : memref<256x256xf32, #tpu.memory_space<vmem>>, vector<256x256xf32>
    %cst = arith.constant dense<0.000000e+00> : vector<16x256xf32>
    %6 = tpu.matmul %4, %5, %cst {dimension_numbers = #tpu.dot_dimension_numbers<[1], [0], [0], [1], [0, 0, 1, 1], [], []>} : vector<16x256xf32>, vector<256x256xf32>, vector<16x256xf32> -> vector<16x256xf32>
    %7 = arith.addf %3, %6 : vector<16x256xf32>
    %c0_6 = arith.constant 0 : index
    %c0_7 = arith.constant 0 : index
    %8 = vector.load %arg6[%c0_6, %c0_7] : memref<16x256xf32, #tpu.memory_space<vmem>>, vector<16x256xf32>
    tpu.vector_store %arg6[%c0_6, %c0_7], %7 {strides = array<i32>} : memref<16x256xf32, #tpu.memory_space<vmem>>, vector<16x256xf32>,
    %c2_i32 = arith.constant 2 : i32
    %9 = arith.cmpi eq, %arg1, %c2_i32 : i32
    %10 = arith.extui %9 : i1 to i32
    %c0_i32_8 = arith.constant 0 : i32
    %11 = arith.cmpi ne, %10, %c0_i32_8 : i32
    scf.if %11 {
      %c0_9 = arith.constant 0 : index
      %c0_10 = arith.constant 0 : index
      %12 = vector.load %arg6[%c0_9, %c0_10] : memref<16x256xf32, #tpu.memory_space<vmem>>, vector<16x256xf32>
      %c0_11 = arith.constant 0 : index
      %c0_12 = arith.constant 0 : index
      %13 = vector.load %arg5[%c0_11, %c0_12] : memref<16x256xf32, #tpu.memory_space<vmem>>, vector<16x256xf32>
      tpu.vector_store %arg5[%c0_11, %c0_12], %12 {strides = array<i32>} : memref<16x256xf32, #tpu.memory_space<vmem>>, vector<16x256xf32>,
    } else {
    }
    return
  }
  func.func @transform_0(%arg0: i32, %arg1: i32) -> (i32, i32) {
    %c0_i32 = arith.constant 0 : i32
    %c0_i32_0 = arith.constant 0 : i32
    return %c0_i32, %arg0 : i32, i32
  }
  func.func @transform_1(%arg0: i32, %arg1: i32) -> (i32, i32) {
    %c0_i32 = arith.constant 0 : i32
    %c0_i32_0 = arith.constant 0 : i32
    return %c0_i32, %arg1 : i32, i32
  }
  func.func @transform_2(%arg0: i32, %arg1: i32) -> (i32, i32) {
    %c0_i32 = arith.constant 0 : i32
    return %arg1, %arg0 : i32, i32
  }
  func.func @transform_3(%arg0: i32, %arg1: i32) -> (i32, i32) {
    %c0_i32 = arith.constant 0 : i32
    %c0_i32_0 = arith.constant 0 : i32
    return %c0_i32, %arg0 : i32, i32
  }
}

</mosaic_0001>

<bundles_post_ra>
// kernel: tpu_custom_call.1
= control target key start
LH: loop header
LB: loop body
LE: loop exit
PB: predicated region body
PF: predicated region fallthrough
CT: control target
= control target key end

     0   :  { %8 = vsyncpa [#allocation4], 0  ;;  %s1265_s0 = inlined_call_operand.hbm [shape: f32[16,256], index: 0, kind: input, shape index: {}]   ;;  %s1266_s1 = inlined_call_operand.hbm [shape: f32[16,768], index: 1, kind: input, shape index: {}]   ;;  %s1267_s2 = inlined_call_operand.hbm [shape: f32[768,256], index: 2, kind: input, shape index: {}]   ;;  %s1268_s3 = inlined_call_operand.hbm [shape: f32[16,256], index: 3, kind: output, shape index: {}]  }
   0x1   :  { %9 = vsyncpa [#allocation7], 0 }
   0x2   :  { %11 = vsyncpa [#allocation7 + $0x1], 0 }
   0x3   :  { %12 = vsyncpa [#allocation5], 0  ;;  %s961_s12 = smov 0   ;;  %s963_s13 = smov 0  }
   0x4   :  { %s965_s14 = smov 0   ;;  %s967_s15 = smov 0  }
   0x5   :  { %s969_s16 = smov 0   ;;  %s971_s17 = smov 0  }
   0x6 LB: > { %s27_s18 = sadd.s32 1, %s926_s16  ;;  %s63_s19 = sadd.s32 1, %s918_s14  ;;  %s930_s17 = sphi %s971_s17, %s18_s17   ;;  %s926_s16 = sphi %s969_s16, %s1294_s16   ;;  %s922_s15 = sphi %s967_s15, %s1293_s15   ;;  %s918_s14 = sphi %s965_s14, %s1292_s14   ;;  %s914_s13 = sphi %s963_s13, %s1291_s13   ;;  %s910_s12 = sphi %s961_s12, %s1290_s12  }
   0x7   : > { %p28_p0 = scmp.ge.s32.totalorder %s27_s18, 3  ;;  %p70_p1 = scmp.ne.s32.totalorder %s918_s14, %s914_s13 }
   0x8   : > { %p71_p2 = scmp.eq.s32.totalorder %s930_s17, 0  ;;  %p699_p5 = scmp.lt.s32.totalorder %s930_s17, 3 }
   0x9   : > { %s1296_s18 = smov (%p28_p0, %s27_s18), 0  ;;  %s170_s22 = sand.u32 1, %s930_s17  }
   0xa   : > { %p998_p3 = por %p71_p2, %p70_p1  ;;  %s60_s21 = ssub.s32 %s926_s16, %s1296_s18 }
   0xb   : > { %p61_p4 = scmp.eq.s32.totalorder %s60_s21, 0  ;;  %s172_s23 = sand.u32 1, %s918_s14  }
   0xc   : > { %s559_s25 = sshll.u32 %s172_s23, 5  ;;  %s576_s26 = sshll.u32 %s926_s16, 8 }
   0xd   : > { %s1008_s24 = scalar_select %p61_p4, %s918_s14, %s63_s19  }
   0xe   : > { %s1016_s29 = scalar_lea.hbm %s1266_s1, %s576_s26  ;;  %s174_s30 = scalar_lea.vmem [#allocation6], %s559_s25 }
   0xf   : > { %s181_s4 = sshll.u32 %s174_s30, 4  ;;  %p1022_p6 = pnand %p699_p5, %p998_p3  ;;  %s1018_s4 = int_to_ptr.vmem [resolvable:$true] %s181_s4 }
  0x10   : > { %s1026_s6 = scalar_lea.sflag [#allocation7], %s170_s22  ;;  %s758_s7 = scalar_lea.hbm %s1016_s29, 512 }
  0x11   : > { %s1278_s5 = scalar_select %p1022_p6, 1, 0 }
  0x12   : > { %p759_p7 = scmp.ne.s32.totalorder %s1016_s29, %s758_s7  ;;  %p1272_p8 = pneg %p1022_p6 }
  0x13   : > { %s763_s10 = scalar_lea.hbm %s1266_s1, 1536  ;;  %p764_p11 = scmp.lt.u32.totalorder %s1016_s29, %s1266_s1 }
  0x14   : > { %p761_p9 = pnand %p1272_p8, %p759_p7  ;;  %p765_p12 = scmp.lt.u32.totalorder %s763_s10, %s758_s7 }
  0x15   : > { %p767_p0 = scmp.lt.u32.totalorder %s758_s7, %s1016_s29 }
  0x16   : > { %p762_p10 = pneg %p761_p9  ;;  %p766_p13 = por %p765_p12, %p764_p11 }
  0x18   : > { %p768_p1 = por %p767_p0, %p766_p13 }
  0x1a   : > { %p769_p2 = pnand %p768_p1, %p762_p10 }
  0x1c   : > { %772 = shalt.err (!%p769_p2)
}
  0x1d   : > { %s773_s20 = scalar_lea.vmem %s1018_s4, 512  ;;  %s932_s21 = smov [#allocation6]  }
  0x1e   : > { %p774_p3 = scmp.ne.s32.totalorder %s1018_s4, %s773_s20  ;;  %s778_s22 = sshll.u32 %s932_s21, 4  ;;  %s779_s22 = int_to_ptr.vmem [resolvable:$false] %s778_s22 }
  0x1f   : > { %s780_s25 = scalar_lea.vmem %s779_s22, 1024  ;;  %p781_p7 = scmp.lt.s32.totalorder %s1018_s4, %s779_s22 }
  0x20   : > { %p776_p4 = pnand %p774_p3, %p1272_p8  ;;  %p782_p9 = scmp.lt.s32.totalorder %s780_s25, %s773_s20 }
  0x22   : > { %p777_p5 = pneg %p776_p4  ;;  %p783_p11 = por %p782_p9, %p781_p7 }
  0x24   : > { %p784_p12 = pnand %p783_p11, %p777_p5 }
  0x26   : > { %787 = shalt.err (!%p784_p12)
}
  0x27   : > { %s933_s26 = smov 768   ;;  %s1269_s27 = smov 256  }
  0x28   : > { %s935_s28 = smov 16   ;;  %s1057_s30 = sadd.s32 4294967295, %s930_s17  }
  0x29   : > { %694 = dma.hbm_to_vmem [thread:$0]  (!%p1022_p6), %s1016_s29, 512, %s1018_s4, %s1026_s6, %s933_s26, %s1269_s27, %s935_s28  }
  0x2a   : > { %p76_p10 = scmp.ne.s32.totalorder %s914_s13, %s910_s12  ;;  %p1271_p13 = scmp.eq.s32.totalorder %s1057_s30, 0 }
  0x2b   : > { %p556_p0 = scmp.ge.s32.totalorder %s930_s17, 1  ;;  %p141_p1 = scmp.lt.s32.totalorder %s930_s17, 4 }
  0x2c   : > { %p1066_p2 = por %p1271_p13, %p76_p10  ;;  %s936_s29 = smov [#allocation3]  }
  0x2d   : > { %p1070_p3 = pnand %p556_p0, %p141_p1  ;;  %s156_s4 = sshll.u32 %s936_s29, 4  ;;  %s157_s4 = int_to_ptr.vmem [resolvable:$true] %s156_s4 }
  0x2e   : > { %s1279_s7 = scalar_select %p1066_p2, 1, 0 }
  0x2f   : > { %s1280_s8 = scalar_select %p1070_p3, 1, 0 }
  0x30   : > { %s562_s9 = sshll.u32 %s172_s23, 9  ;;  %p687_p4 = pneg %p1070_p3 }
  0x31   : > { %s578_s12 = sshll.u32 %s926_s16, 13  ;;  %s195_s10 = scalar_lea.vmem [#allocation8], %s562_s9 }
  0x32   : > { %s205_s11 = sshll.u32 %s195_s10, 4  ;;  %p1081_p5 = pnand %p687_p4, %p1271_p13  ;;  %s1090_s11 = int_to_ptr.vmem [resolvable:$true] %s205_s11 }
  0x33   : > { %s1088_s22 = scalar_lea.hbm %s1267_s2, %s578_s12  ;;  %s788_s26 = scalar_lea.hbm %s1265_s0, 512 }
  0x34   : > { %p789_p7 = scmp.ne.s32.totalorder %s1265_s0, %s788_s26  ;;  %p790_p9 = pneg %p1081_p5 }
  0x35   : > { %p795_p10 = scmp.lt.u32.totalorder %s788_s26, %s1265_s0 }
  0x36   : > { %p791_p11 = pnand %p790_p9, %p789_p7 }
  0x38   : > { %p792_p12 = pneg %p791_p11 }
  0x3a   : > { %p797_p0 = pnand %p795_p10, %p792_p12 }
  0x3c   : > { %800 = shalt.err (!%p797_p0)
}
  0x3d   : > { %s801_s12 = scalar_lea.vmem %s157_s4, 512  ;;  %p809_p8 = scmp.lt.s32.totalorder %s157_s4, %s157_s4 }
  0x3e   : > { %p802_p1 = scmp.ne.s32.totalorder %s157_s4, %s801_s12  ;;  %p810_p2 = scmp.lt.s32.totalorder %s801_s12, %s801_s12 }
  0x40   : > { %p804_p4 = pnand %p802_p1, %p790_p9  ;;  %p811_p3 = por %p810_p2, %p809_p8 }
  0x42   : > { %p805_p13 = pneg %p804_p4 }
  0x44   : > { %p812_p6 = pnand %p811_p3, %p805_p13 }
  0x46   : > { %815 = shalt.err (!%p812_p6)
}
  0x47   : > { %s1282_s20 = smov 256   ;;  %s816_s27 = scalar_lea.hbm %s1088_s22, 8192 }
  0x48   : > { %690 = dma.hbm_to_vmem [thread:$0]  (!%p1081_p5), %s1265_s0, 512, %s157_s4, [#allocation4], %s1282_s20, %s1282_s20, %s935_s28  }
  0x49   : > { %p817_p7 = scmp.ne.s32.totalorder %s1088_s22, %s816_s27  ;;  %p1283_p9 = scmp.ne.s32.totalorder %s1278_s5, 0 }
  0x4a   : > { %s821_s26 = scalar_lea.hbm %s1267_s2, 24576  ;;  %p822_p2 = scmp.lt.u32.totalorder %s1088_s22, %s1267_s2 }
  0x4b   : > { %p1284_p8 = pneg %p1283_p9  ;;  %p823_p3 = scmp.lt.u32.totalorder %s821_s26, %s816_s27 }
  0x4c   : > { %p825_p12 = scmp.lt.u32.totalorder %s816_s27, %s1088_s22 }
  0x4d   : > { %p819_p13 = pnand %p817_p7, %p1284_p8  ;;  %p824_p11 = por %p823_p3, %p822_p2 }
  0x4f   : > { %p820_p6 = pneg %p819_p13  ;;  %p826_p10 = por %p825_p12, %p824_p11 }
  0x51   : > { %p827_p0 = pnand %p826_p10, %p820_p6 }
  0x53   : > { %830 = shalt.err (!%p827_p0)
}
  0x54   : > { %s831_s4 = scalar_lea.vmem %s1090_s11, 8192  ;;  %p1285_p1 = pmov %p1284_p8 }
  0x55   : > { %p832_p5 = scmp.ne.s32.totalorder %s1090_s11, %s831_s4  ;;  %s937_s10 = smov [#allocation8]  }
  0x56   : > { %s836_s12 = sshll.u32 %s937_s10, 4  ;;  %s837_s12 = int_to_ptr.vmem [resolvable:$false] %s836_s12 }
  0x57   : > { %p834_p4 = pnand %p832_p5, %p1285_p1  ;;  %s838_s21 = scalar_lea.vmem %s837_s12, 16384 }
  0x58   : > { %p839_p8 = scmp.lt.s32.totalorder %s1090_s11, %s837_s12  ;;  %p840_p13 = scmp.lt.s32.totalorder %s838_s21, %s831_s4 }
  0x59   : > { %p835_p7 = pneg %p834_p4 }
  0x5a   : > { %p841_p2 = por %p840_p13, %p839_p8 }
  0x5c   : > { %p842_p3 = pnand %p841_p2, %p835_p7 }
  0x5e   : > { %845 = shalt.err (!%p842_p3)
}
  0x5f   : > { %697 = dma.hbm_to_vmem [thread:$0]  (!%p1283_p9), %s1088_s22, 8192, %s1090_s11, %s1026_s6, %s1282_s20, %s1282_s20, %s935_s28  }
  0x60   : > { %p1286_p6 = scmp.ne.s32.totalorder %s1280_s8, 0 }
  0x61   : > { %p1287_p11 = scmp.eq.s32.totalorder (!%p1286_p6), %s1057_s30, 0 }
  0x62   : > { %217 = sbr.rel (%p1286_p6) target bundleno = 437 (0x1b5), region = 32 }
  0x69   : > { %897 = dma.done.wait (%p1287_p11), [#allocation4], 512   ;;  %p1288_p12 = pmov %p1287_p11 }
  0x6a   : > { %s223_s5 = sand.u32 1, %s1057_s30   ;;  %s225_s23 = sand.u32 1, %s914_s13  }
  0x6b   : > { %899 = vsyncadd (%p1288_p12), [#allocation4], 4294966784  ;;  %s568_s27 = sshll.u32 %s225_s23, 5  ;;  %s224_s25 = scalar_lea.sflag [#allocation7], %s223_s5 }
  0x6c   : > { %s1146_s19 = scalar_lea.vmem [#allocation6], %s568_s27  ;;  %p1289_p10 = scmp.ne.s32.totalorder %s1279_s7, 0 }
  0x6e   : > { %901 = dma.done.wait (%p1289_p10), %s224_s25, 8704  }
  0x6f   : > { %903 = vsyncadd (%p1289_p10), %s224_s25, 4294958592  ;;  %s569_s6 = sshll.u32 %s225_s23, 9  ;;  %p570_p9 = scmp.ne.s32.totalorder %s922_s15, 0 }
  0x70   : > { %s1152_s28 = scalar_lea.vmem [#allocation8], %s569_s6  ;;  %v268_v0 = vld [vmem:[#allocation3] sm:$0xff] (!%p570_p9)  ;;  %v269_v1 = vld [vmem:[#allocation3 + $0x8] sm:$0xff] (!%p570_p9)  ;;  %v270_v2 = vld [vmem:[#allocation3 + $0x10] sm:$0xff] (!%p570_p9) }
  0x71   : > { %267 = sbr.rel (%p570_p9) target bundleno = 120 (0x78), region = 48  ;;  %272 = vst [vmem:[#allocation2] sm:$0xff] (!%p570_p9), %v268_v0  ;;  %273 = vst [vmem:[#allocation2 + $0x8] sm:$0xff] (!%p570_p9), %v269_v1  ;;  %v271_v3 = vld [vmem:[#allocation3 + $0x18] sm:$0xff] (!%p570_p9) }
  0x72   : > { %274 = vst [vmem:[#allocation2 + $0x10] sm:$0xff] (!%p570_p9), %v270_v2  ;;  %275 = vst [vmem:[#allocation2 + $0x18] sm:$0xff] (!%p570_p9), %v271_v3 }
  0x78 PF: > { %v285_v4 = vld [vmem:[%s1152_s28 + $0x8] sm:$0xff]  ;;  %v287_v5 = vld [vmem:[%s1152_s28 + $0x18] sm:$0xff]  ;;  %v284_v6 = vld [vmem:[%s1152_s28] sm:$0xff]  ;;  %p571_p0 = scmp.ne.s32.totalorder %s922_s15, 2 }
  0x79   : > { %v579_v7 = vpack.c.bf16 %v287_v5, %v285_v4  ;;  %v286_v8 = vld [vmem:[%s1152_s28 + $0x10] sm:$0xff]  ;;  %v289_v9 = vld [vmem:[%s1152_s28 + $0x28] sm:$0xff]  ;;  %v291_v10 = vld [vmem:[%s1152_s28 + $0x38] sm:$0xff] }
  0x7a   : > { %v581_v11 = vpack.c.bf16 %v286_v8, %v284_v6  ;;  %v583_v12 = vpack.c.bf16 %v291_v10, %v289_v9  ;;  %v288_v13 = vld [vmem:[%s1152_s28 + $0x20] sm:$0xff]  ;;  %v290_v14 = vld [vmem:[%s1152_s28 + $0x30] sm:$0xff]  ;;  %v293_v15 = vld [vmem:[%s1152_s28 + $0x48] sm:$0xff] }
  0x7b   : > { %580 = vmatprep.subr.bf16.mxu0 %v579_v7  ;;  %643 = vmatprep.subr.bf16.mxu1 %v579_v7  ;;  %v295_v16 = vld [vmem:[%s1152_s28 + $0x58] sm:$0xff]  ;;  %v585_v17 = vpack.c.bf16 %v290_v14, %v288_v13  ;;  %v292_v19 = vld [vmem:[%s1152_s28 + $0x40] sm:$0xff]  ;;  %v294_v20 = vld [vmem:[%s1152_s28 + $0x50] sm:$0xff] }
  0x7c   : > { %582 = vmatpush1.bf16.msra.mxu0 %v581_v11  ;;  %659 = vmatpush1.bf16.msra.mxu1 %v581_v11  ;;  %v587_v18 = vpack.c.bf16 %v295_v16, %v293_v15  ;;  %v297_v21 = vld [vmem:[%s1152_s28 + $0x68] sm:$0xff]  ;;  %v299_v22 = vld [vmem:[%s1152_s28 + $0x78] sm:$0xff]  ;;  %v589_v23 = vpack.c.bf16 %v294_v20, %v292_v19  ;;  %v296_v25 = vld [vmem:[%s1152_s28 + $0x60] sm:$0xff] }
  0x7d   : > { %584 = vmatprep.subr.bf16.mxu0 %v583_v12  ;;  %644 = vmatprep.subr.bf16.mxu1 %v583_v12  ;;  %v591_v24 = vpack.c.bf16 %v299_v22, %v297_v21  ;;  %v298_v26 = vld [vmem:[%s1152_s28 + $0x70] sm:$0xff]  ;;  %v301_v27 = vld [vmem:[%s1152_s28 + $0x88] sm:$0xff]  ;;  %v303_v28 = vld [vmem:[%s1152_s28 + $0x98] sm:$0xff] }
  0x7e   : > { %v593_v29 = vpack.c.bf16 %v298_v26, %v296_v25  ;;  %v595_v30 = vpack.c.bf16 %v303_v28, %v301_v27  ;;  %v300_v31 = vld [vmem:[%s1152_s28 + $0x80] sm:$0xff]  ;;  %v302_v32 = vld [vmem:[%s1152_s28 + $0x90] sm:$0xff]  ;;  %v305_v33 = vld [vmem:[%s1152_s28 + $0xa8] sm:$0xff] }
  0x7f   : > { %v307_v34 = vld [vmem:[%s1152_s28 + $0xb8] sm:$0xff]  ;;  %v597_v35 = vpack.c.bf16 %v302_v32, %v300_v31  ;;  %v304_v37 = vld [vmem:[%s1152_s28 + $0xa0] sm:$0xff]  ;;  %v306_v38 = vld [vmem:[%s1152_s28 + $0xb0] sm:$0xff] }
  0x80   : > { %586 = vmatpush1.bf16.msra.mxu0 %v585_v17  ;;  %660 = vmatpush1.bf16.msra.mxu1 %v585_v17  ;;  %v599_v36 = vpack.c.bf16 %v307_v34, %v305_v33  ;;  %v309_v39 = vld [vmem:[%s1152_s28 + $0xc8] sm:$0xff]  ;;  %v311_v40 = vld [vmem:[%s1152_s28 + $0xd8] sm:$0xff]  ;;  %v601_v41 = vpack.c.bf16 %v306_v38, %v304_v37  ;;  %v308_v42 = vld [vmem:[%s1152_s28 + $0xc0] sm:$0xff] }
  0x81   : > { %588 = vmatprep.subr.bf16.mxu0 %v587_v18  ;;  %645 = vmatprep.subr.bf16.mxu1 %v587_v18  ;;  %v603_v43 = vpack.c.bf16 %v311_v40, %v309_v39  ;;  %v310_v44 = vld [vmem:[%s1152_s28 + $0xd0] sm:$0xff]  ;;  %v281_v45 = vld [vmem:[%s1146_s19 + $0x8] sm:$0xff]  ;;  %v283_v46 = vld [vmem:[%s1146_s19 + $0x18] sm:$0xff] }
  0x82   : > { %v313_v47 = vld [vmem:[%s1152_s28 + $0xe8] sm:$0xff]  ;;  %v315_v48 = vld [vmem:[%s1152_s28 + $0xf8] sm:$0xff]  ;;  %412 = vmatprep.mubr.f32.mxu0 %v281_v45  ;;  %418 = vmatprep.mubr.f32.mxu1 %v283_v46  ;;  %v605_v49 = vpack.c.bf16 %v310_v44, %v308_v42  ;;  %v312_v51 = vld [vmem:[%s1152_s28 + $0xe0] sm:$0xff] }
  0x83   : > { %v607_v50 = vpack.c.bf16 %v315_v48, %v313_v47  ;;  %v314_v52 = vld [vmem:[%s1152_s28 + $0xf0] sm:$0xff]  ;;  %v317_v53 = vld [vmem:[%s1152_s28 + $0x108] sm:$0xff]  ;;  %v319_v54 = vld [vmem:[%s1152_s28 + $0x118] sm:$0xff] }
  0x84   : > { %590 = vmatpush1.bf16.msra.mxu0 %v589_v23  ;;  %661 = vmatpush1.bf16.msra.mxu1 %v589_v23  ;;  %v609_v55 = vpack.c.bf16 %v314_v52, %v312_v51  ;;  %v611_v56 = vpack.c.bf16 %v319_v54, %v317_v53  ;;  %v316_v57 = vld [vmem:[%s1152_s28 + $0x100] sm:$0xff]  ;;  %v318_v58 = vld [vmem:[%s1152_s28 + $0x110] sm:$0xff]  ;;  %v321_v59 = vld [vmem:[%s1152_s28 + $0x128] sm:$0xff] }
  0x85   : > { %592 = vmatprep.subr.bf16.mxu0 %v591_v24  ;;  %646 = vmatprep.subr.bf16.mxu1 %v591_v24  ;;  %v323_v60 = vld [vmem:[%s1152_s28 + $0x138] sm:$0xff]  ;;  %v613_v61 = vpack.c.bf16 %v318_v58, %v316_v57  ;;  %v320_v63 = vld [vmem:[%s1152_s28 + $0x120] sm:$0xff]  ;;  %v322_v0 = vld [vmem:[%s1152_s28 + $0x130] sm:$0xff] }
  0x86   : > { %v615_v62 = vpack.c.bf16 %v323_v60, %v321_v59  ;;  %v325_v1 = vld [vmem:[%s1152_s28 + $0x148] sm:$0xff]  ;;  %v327_v2 = vld [vmem:[%s1152_s28 + $0x158] sm:$0xff]  ;;  %v617_v3 = vpack.c.bf16 %v322_v0, %v320_v63  ;;  %v324_v5 = vld [vmem:[%s1152_s28 + $0x140] sm:$0xff] }
  0x87   : > { %v619_v4 = vpack.c.bf16 %v327_v2, %v325_v1  ;;  %v326_v6 = vld [vmem:[%s1152_s28 + $0x150] sm:$0xff]  ;;  %v329_v7 = vld [vmem:[%s1152_s28 + $0x168] sm:$0xff]  ;;  %v331_v8 = vld [vmem:[%s1152_s28 + $0x178] sm:$0xff] }
  0x88   : > { %594 = vmatpush1.bf16.msra.mxu0 %v593_v29  ;;  %662 = vmatpush1.bf16.msra.mxu1 %v593_v29  ;;  %v621_v9 = vpack.c.bf16 %v326_v6, %v324_v5  ;;  %v623_v10 = vpack.c.bf16 %v331_v8, %v329_v7  ;;  %v328_v11 = vld [vmem:[%s1152_s28 + $0x160] sm:$0xff]  ;;  %v330_v12 = vld [vmem:[%s1152_s28 + $0x170] sm:$0xff]  ;;  %v333_v13 = vld [vmem:[%s1152_s28 + $0x188] sm:$0xff] }
  0x89   : > { %596 = vmatprep.subr.bf16.mxu0 %v595_v30  ;;  %647 = vmatprep.subr.bf16.mxu1 %v595_v30  ;;  %v335_v14 = vld [vmem:[%s1152_s28 + $0x198] sm:$0xff]  ;;  %v625_v15 = vpack.c.bf16 %v330_v12, %v328_v11  ;;  %v332_v17 = vld [vmem:[%s1152_s28 + $0x180] sm:$0xff]  ;;  %v334_v18 = vld [vmem:[%s1152_s28 + $0x190] sm:$0xff] }
  0x8a   : > { %v627_v16 = vpack.c.bf16 %v335_v14, %v333_v13  ;;  %v337_v19 = vld [vmem:[%s1152_s28 + $0x1a8] sm:$0xff]  ;;  %v339_v20 = vld [vmem:[%s1152_s28 + $0x1b8] sm:$0xff]  ;;  %v629_v21 = vpack.c.bf16 %v334_v18, %v332_v17  ;;  %v336_v23 = vld [vmem:[%s1152_s28 + $0x1a0] sm:$0xff] }
  0x8b   : > { %v631_v22 = vpack.c.bf16 %v339_v20, %v337_v19  ;;  %v338_v24 = vld [vmem:[%s1152_s28 + $0x1b0] sm:$0xff]  ;;  %v341_v25 = vld [vmem:[%s1152_s28 + $0x1c8] sm:$0xff]  ;;  %v343_v26 = vld [vmem:[%s1152_s28 + $0x1d8] sm:$0xff] }
  0x8c   : > { %598 = vmatpush1.bf16.msra.mxu0 %v597_v35  ;;  %663 = vmatpush1.bf16.msra.mxu1 %v597_v35  ;;  %v633_v27 = vpack.c.bf16 %v338_v24, %v336_v23  ;;  %v635_v28 = vpack.c.bf16 %v343_v26, %v341_v25  ;;  %v340_v29 = vld [vmem:[%s1152_s28 + $0x1c0] sm:$0xff]  ;;  %v342_v30 = vld [vmem:[%s1152_s28 + $0x1d0] sm:$0xff]  ;;  %v345_v31 = vld [vmem:[%s1152_s28 + $0x1e8] sm:$0xff] }
  0x8d   : > { %600 = vmatprep.subr.bf16.mxu0 %v599_v36  ;;  %648 = vmatprep.subr.bf16.mxu1 %v599_v36  ;;  %v347_v32 = vld [vmem:[%s1152_s28 + $0x1f8] sm:$0xff]  ;;  %v637_v33 = vpack.c.bf16 %v342_v30, %v340_v29  ;;  %v344_v35 = vld [vmem:[%s1152_s28 + $0x1e0] sm:$0xff]  ;;  %v346_v36 = vld [vmem:[%s1152_s28 + $0x1f0] sm:$0xff] }
  0x8e   : > { %v639_v34 = vpack.c.bf16 %v347_v32, %v345_v31  ;;  %v641_v37 = vpack.c.bf16 %v346_v36, %v344_v35  ;;  %v280_v38 = vld [vmem:[%s1146_s19] sm:$0xff]  ;;  %v282_v39 = vld [vmem:[%s1146_s19 + $0x10] sm:$0xff]  ;;  %v277_v42 = vld [vmem:[#allocation2 + $0x8] sm:$0xff] }
  0x8f   : > { %v276_v40 = vld [vmem:[#allocation2] sm:$0xff] }
  0x90   : > { %602 = vmatpush1.bf16.msra.mxu0 %v601_v41  ;;  %664 = vmatpush1.bf16.msra.mxu1 %v601_v41  ;;  %v278_v41 = vld [vmem:[#allocation2 + $0x10] sm:$0xff] }
  0x91   : > { %604 = vmatprep.subr.bf16.mxu0 %v603_v43  ;;  %649 = vmatprep.subr.bf16.mxu1 %v603_v43  ;;  %v279_v43 = vld [vmem:[#allocation2 + $0x18] sm:$0xff] }
  0x94   : > { %606 = vmatpush1.bf16.msra.mxu0 %v605_v49  ;;  %665 = vmatpush1.bf16.msra.mxu1 %v605_v49 }
  0x95   : > { %608 = vmatprep.subr.bf16.mxu0 %v607_v50  ;;  %650 = vmatprep.subr.bf16.mxu1 %v607_v50 }
  0x98   : > { %610 = vmatpush1.bf16.msra.mxu0 %v609_v55  ;;  %666 = vmatpush1.bf16.msra.mxu1 %v609_v55 }
  0x99   : > { %612 = vmatprep.subr.bf16.mxu0 %v611_v56  ;;  %651 = vmatprep.subr.bf16.mxu1 %v611_v56 }
  0x9c   : > { %614 = vmatpush1.bf16.msra.mxu0 %v613_v61  ;;  %667 = vmatpush1.bf16.msra.mxu1 %v613_v61 }
  0x9d   : > { %616 = vmatprep.subr.bf16.mxu0 %v615_v62  ;;  %652 = vmatprep.subr.bf16.mxu1 %v615_v62 }
  0xa0   : > { %618 = vmatpush1.bf16.msra.mxu0 %v617_v3  ;;  %668 = vmatpush1.bf16.msra.mxu1 %v617_v3 }
  0xa1   : > { %620 = vmatprep.subr.bf16.mxu0 %v619_v4  ;;  %653 = vmatprep.subr.bf16.mxu1 %v619_v4 }
  0xa4   : > { %622 = vmatpush1.bf16.msra.mxu0 %v621_v9  ;;  %669 = vmatpush1.bf16.msra.mxu1 %v621_v9 }
  0xa5   : > { %624 = vmatprep.subr.bf16.mxu0 %v623_v10  ;;  %654 = vmatprep.subr.bf16.mxu1 %v623_v10 }
  0xa8   : > { %626 = vmatpush1.bf16.msra.mxu0 %v625_v15  ;;  %670 = vmatpush1.bf16.msra.mxu1 %v625_v15 }
  0xa9   : > { %628 = vmatprep.subr.bf16.mxu0 %v627_v16  ;;  %655 = vmatprep.subr.bf16.mxu1 %v627_v16 }
  0xac   : > { %630 = vmatpush1.bf16.msra.mxu0 %v629_v21  ;;  %671 = vmatpush1.bf16.msra.mxu1 %v629_v21 }
  0xad   : > { %632 = vmatprep.subr.bf16.mxu0 %v631_v22  ;;  %656 = vmatprep.subr.bf16.mxu1 %v631_v22 }
  0xb0   : > { %634 = vmatpush1.bf16.msra.mxu0 %v633_v27  ;;  %672 = vmatpush1.bf16.msra.mxu1 %v633_v27 }
  0xb1   : > { %636 = vmatprep.subr.bf16.mxu0 %v635_v28  ;;  %657 = vmatprep.subr.bf16.mxu1 %v635_v28 }
  0xb4   : > { %638 = vmatpush1.bf16.msra.mxu0 %v637_v33  ;;  %673 = vmatpush1.bf16.msra.mxu1 %v637_v33 }
  0xb5   : > { %640 = vmatprep.subr.bf16.mxu0 %v639_v34  ;;  %658 = vmatprep.subr.bf16.mxu1 %v639_v34 }
  0xb8   : > { %642 = vmatpush1.bf16.msra.mxu0 %v641_v37  ;;  %674 = vmatpush1.bf16.msra.mxu1 %v641_v37 }
  0xbb   : > { %413 = vmatmul.mubr.f32.vlgmr.msra.gmra.mrb[0].mxu0 %v280_v38  ;;  %419 = vmatmul.mubr.f32.vlgmr.msra.gmra.mrb[0].mxu1 %v282_v39 }
 0x18c   : > { %436 = sbr.rel (%p571_p0) target bundleno = 411 (0x19b), region = 52 }
 0x18e   : > { %v414_v44 = vpop.f32.mrb[0].mxu0  ;;  %v420_v45 = vpop.f32.mrb[0].mxu1 }
 0x18f   : > { %v425_v46 = vadd.f32 %v414_v44, %v276_v40  ;;  %v427_v47 = vadd.f32 %v420_v45, %v278_v41  ;;  %v416_v48 = vpop.f32.mrb[1].mxu0  ;;  %v422_v49 = vpop.f32.mrb[1].mxu1 }
 0x190   : > { %v426_v50 = vadd.f32 %v416_v48, %v277_v42  ;;  %v428_v51 = vadd.f32 %v422_v49, %v279_v43 }
 0x191   : > { %429 = vst [vmem:[#allocation2] sm:$0xff] %v425_v46  ;;  %431 = vst [vmem:[#allocation2 + $0x10] sm:$0xff] %v427_v47 }
 0x192   : > { %430 = vst [vmem:[#allocation2 + $0x8] sm:$0xff] %v426_v50  ;;  %432 = vst [vmem:[#allocation2 + $0x18] sm:$0xff] %v428_v51 }
 0x198   : > { %v437_v52 = vld [vmem:[#allocation2] sm:$0xff]  ;;  %v439_v54 = vld [vmem:[#allocation2 + $0x10] sm:$0xff] }
 0x199   : > { %v438_v53 = vld [vmem:[#allocation2 + $0x8] sm:$0xff]  ;;  %441 = vst [vmem:[#allocation9] sm:$0xff] %v437_v52  ;;  %443 = vst [vmem:[#allocation9 + $0x10] sm:$0xff] %v439_v54  ;;  %v440_v55 = vld [vmem:[#allocation2 + $0x18] sm:$0xff] }
 0x19a   : > { %442 = vst [vmem:[#allocation9 + $0x8] sm:$0xff] %v438_v53  ;;  %444 = vst [vmem:[#allocation9 + $0x18] sm:$0xff] %v440_v55 }
 0x19b PF: > { %p701_p5 = scmp.eq.s32.totalorder %s1057_s30, 2  ;;  %s938_s7 = smov [#allocation9]  }
 0x19c   : > { %s454_s8 = sshll.u32 %s938_s7, 4  ;;  %s455_s8 = int_to_ptr.vmem [resolvable:$true] %s454_s8 }
 0x19d   : > { %s846_s11 = scalar_lea.vmem %s455_s8, 512  ;;  %p853_p8 = scmp.lt.s32.totalorder %s455_s8, %s455_s8 }
 0x19e   : > { %p847_p1 = scmp.ne.s32.totalorder %s455_s8, %s846_s11  ;;  %p854_p13 = scmp.lt.s32.totalorder %s846_s11, %s846_s11 }
 0x1a0   : > { %p848_p4 = pnand %p847_p1, %p701_p5  ;;  %p855_p2 = por %p854_p13, %p853_p8 }
 0x1a2   : > { %p849_p7 = pneg %p848_p4 }
 0x1a4   : > { %p856_p3 = pnand %p855_p2, %p849_p7 }
 0x1a6   : > { %859 = shalt.err (!%p856_p3)
}
 0x1a7   : > { %s860_s20 = scalar_lea.hbm %s1268_s3, 512 }
 0x1a8   : > { %p861_p6 = scmp.ne.s32.totalorder %s1268_s3, %s860_s20  ;;  %p866_p10 = scmp.lt.u32.totalorder %s860_s20, %s1268_s3 }
 0x1aa   : > { %p862_p11 = pnand %p861_p6, %p701_p5 }
 0x1ac   : > { %p863_p12 = pneg %p862_p11 }
 0x1ae   : > { %p868_p9 = pnand %p866_p10, %p863_p12 }
 0x1b0   : > { %871 = shalt.err (!%p868_p9)
}
 0x1b1   : > { %s939_s10 = smov 256   ;;  %s940_s12 = smov 16  }
 0x1b2   : > { %684 = dma.vmem_to_hbm [thread:$0]  (%p701_p5), %s455_s8, 512, %s1268_s3, [#allocation5], %s939_s10, %s939_s10, %s940_s12  }
 0x1b3   : > { %905 = dma.done.wait (%p701_p5), [#allocation5], 512  }
 0x1b4   : > { %907 = vsyncadd (%p701_p5), [#allocation5], 4294966784 }
 0x1b5 PF: > { %s18_s17 = sadd.s32 1, %s930_s17   ;;  %s1290_s12 = smov %s914_s13 }
 0x1b6   : > { %p15_p0 = scmp.ge.s32.totalorder %s18_s17, 5   ;;  %s1291_s13 = smov %s918_s14 }
 0x1b7   : > { %s1292_s14 = smov %s1008_s24  ;;  %s1293_s15 = smov %s926_s16 }
 0x1b8   : > { %s1294_s16 = smov %s1296_s18  ;;  %17 = sbr.rel (!%p15_p0) target bundleno = 6 (0x6), region = 95 }
 0x1bf   :  { %470 = vsyncpa [#allocation4], 1 }
 0x1c0   :  { %472 = vsyncpa [#allocation4 + $0x1], 1 }
 0x1c1   :  { %473 = vsyncpa [#allocation7], 1 }
 0x1c2   :  { %475 = vsyncpa [#allocation7 + $0x1], 1 }
 0x1c3   :  { %476 = vsyncpa [#allocation5], 1 }
 0x1c4   :  { %478 = vsyncpa [#allocation5 + $0x1], 1 }

</bundles_post_ra>
